<compile_context>
chip_gen: v6e
topology: v6e:2x2x1
jax: 0.10.0
libtpu: 0.0.40
codegen_flags: <defaults>
</compile_context>

<pallas_src>
import jax
import jax.numpy as jnp
from jax.experimental import pallas as pl
from jax.experimental.pallas import tpu as pltpu


def _summer_add_kernel(e_ref, x_ref, o_ref):
    # e_ref: (tr, 1) f32 positional-encoding rows (resident across lane tiles).
    # x_ref / o_ref: (tr, tn) tile of the flattened (B*C, N) tensor.
    o_ref[...] = (x_ref[...].astype(jnp.float32) + e_ref[...]).astype(o_ref.dtype)


def _divisors_desc(n):
    ds = set()
    i = 1
    while i * i <= n:
        if n % i == 0:
            ds.add(i)
            ds.add(n // i)
        i += 1
    return sorted(ds, reverse=True)


def _vmem_budget_bytes():
    """Per-generation (tile budget, scoped VMEM limit)."""
    phys = 128 * 1024 * 1024
    try:
        info = pltpu.get_tpu_info()
        phys = int(getattr(info, "vmem_capacity_bytes", phys)) or phys
    except Exception:
        phys = 64 * 1024 * 1024  # conservative fallback (v7x per-core size)
    # Leave headroom for pipeline bookkeeping / internal scratch.
    budget = min(int(phys * 0.70), 96 * 1024 * 1024)   # v7x ~44 MiB, v5e/v6e ~90 MiB
    limit = min(int(phys * 0.85), 112 * 1024 * 1024)
    return budget, limit


def _pick_tiles(rows, n, itemsize, budget):
    """Pick (tile_rows, tile_n).

    tile_n: largest multiple of 128 that divides N (lane-dense, unmasked
    stores, no remainder tile).  tile_rows: largest multiple of 8 dividing
    rows such that the double-buffered in+out tiles fit the budget — rows are
    shrunk before lanes.  For large inputs force >= 2 grid steps so the
    'parallel' grid shards across both TensorCores on v7x.
    """
    lane_cands = [d for d in _divisors_desc(n) if d % 128 == 0] or [n]
    row_cands = [d for d in _divisors_desc(rows) if d % 8 == 0] or [rows]

    def fits(tr, tn):
        # 2 pipeline buffers x (input tile + output tile)
        return 4 * tr * tn * itemsize <= budget

    chosen = None
    for tn in lane_cands:              # largest lane tile first
        for tr in row_cands:           # shrink rows before shrinking lanes
            if fits(tr, tn):
                chosen = (tr, tn)
                break
        if chosen is not None:
            break
    if chosen is None:                 # pathological shape; smallest legal tile
        chosen = (row_cands[-1], lane_cands[-1])

    tr, tn = chosen
    n_steps = pl.cdiv(rows, tr) * pl.cdiv(n, tn)
    if n_steps < 2 and rows * n * itemsize > (2 << 20):
        # Never leave a big problem as a single grid step (v7x 2-TC sharding).
        smaller_lane = [d for d in lane_cands if d < tn]
        smaller_row = [d for d in row_cands if d < tr]
        if smaller_lane:
            tn = smaller_lane[0]
        elif smaller_row:
            tr = smaller_row[0]
    return tr, tn


def summer_forward(tensor, batch, xyz, params, *,
                   donate_tensor=False,
                   small_bytes_threshold=2 * 1024 * 1024):
    """tensor: (B, C, N), xyz: (B, 3) -> tensor + penc(xyz)[:, :, None].

    `batch` accepted for API parity with Summer.forward(tensor, batch, xyz);
    the learned 3D-coordinate MLP encoder only needs xyz.
    """
    # TODO(synk): the original `penc` is an arbitrary submodule; a learned
    # 3D-coordinate MLP encoder (xyz -> (B, C)) is the concrete choice here.
    del batch
    B, C, N = tensor.shape
    w1, b1, w2, b2 = params

    # ---- penc hoisted out of the kernel: tiny (B, C) compute, done once ----
    h = jnp.maximum(jnp.dot(xyz, w1, preferred_element_type=jnp.float32) + b1, 0.0)
    e = jnp.dot(h, w2, preferred_element_type=jnp.float32) + b2        # (B, C) f32

    rows = B * C
    itemsize = jnp.dtype(tensor.dtype).itemsize
    total_bytes = rows * N * itemsize

    # Small-problem fast path: pallas_call launch/pipeline overhead dominates.
    if total_bytes < small_bytes_threshold:
        return (tensor.astype(jnp.float32) + e[:, :, None]).astype(tensor.dtype)

    x2 = tensor.reshape(rows, N)       # contiguous reshape: free
    e2 = e.reshape(rows, 1)            # stays f32; add accumulates in f32

    budget, vmem_limit = _vmem_budget_bytes()
    tr, tn = _pick_tiles(rows, N, itemsize, budget)
    grid = (pl.cdiv(rows, tr), pl.cdiv(N, tn))

    cost = pl.CostEstimate(
        flops=rows * N,
        transcendentals=0,
        bytes_accessed=2 * rows * N * itemsize + rows * 4,
    )

    out2 = pl.pallas_call(
        _summer_add_kernel,
        out_shape=jax.ShapeDtypeStruct((rows, N), tensor.dtype),
        grid_spec=pltpu.PrefetchScalarGridSpec(
            num_scalar_prefetch=0,
            grid=grid,
            in_specs=[
                # Encoding block depends only on the row coordinate, so it is
                # VMEM-resident across all lane tiles of a row block.
                pl.BlockSpec((tr, 1), lambda r, l: (r, 0)),
                pl.BlockSpec((tr, tn), lambda r, l: (r, l)),
            ],
            out_specs=pl.BlockSpec((tr, tn), lambda r, l: (r, l)),
        ),
        compiler_params=pltpu.CompilerParams(
            dimension_semantics=("parallel", "parallel"),
            vmem_limit_bytes=vmem_limit,
        ),
        cost_estimate=cost,
        # Footprint/latency win when the caller no longer needs `tensor`.
        input_output_aliases={1: 0} if donate_tensor else {},
    )(e2, x2)

    return out2.reshape(B, C, N)


def summer_reference(tensor, xyz, params):
    w1, b1, w2, b2 = params
    h = jnp.maximum(xyz @ w1 + b1, 0.0)
    e = h @ w2 + b2
    return tensor + e[:, :, None]


if __name__ == "__main__":
    key = jax.random.PRNGKey(0)
    k_t, k_xyz, k1, k2, k3, k4 = jax.random.split(key, 6)

    B, C, N = 2, 32, 512
    tensor = jax.random.normal(k_t, (B, C, N), dtype=jnp.float32)
    xyz = jax.random.uniform(k_xyz, (B, 3), dtype=jnp.float32)

    # Deterministic penc parameters (learned 3D positional-encoding MLP).
    w1 = 0.1 * jax.random.normal(k1, (3, C), dtype=jnp.float32)
    b1 = 0.01 * jax.random.normal(k2, (1, C), dtype=jnp.float32)
    w2 = 0.1 * jax.random.normal(k3, (C, C), dtype=jnp.float32)
    b2 = 0.01 * jax.random.normal(k4, (1, C), dtype=jnp.float32)
    params = (w1, b1, w2, b2)

    ref = summer_reference(tensor, xyz, params)

    # Pallas path (threshold disabled so the kernel itself runs at this size).
    out_pallas = summer_forward(tensor, None, xyz, params, small_bytes_threshold=0)
    out_pallas = jax.block_until_ready(out_pallas)
    if not bool(jnp.allclose(out_pallas, ref, atol=1e-5, rtol=1e-5)):
        raise AssertionError("Pallas Summer kernel does not match reference")

    # Default path (small input -> fused XLA fast path).
    out_fast = summer_forward(tensor, None, xyz, params)
    out_fast = jax.block_until_ready(out_fast)
    if not bool(jnp.allclose(out_fast, ref, atol=1e-5, rtol=1e-5)):
        raise AssertionError("Small-input fast path does not match reference")

    print("KERNEL_OK")
</pallas_src>

<mosaic_0001>
module attributes {stable_mosaic.version = 11 : i64} {
  func.func @_summer_add_kernel(%arg0: i32, %arg1: i32, %arg2: memref<64x1xf32, #tpu.memory_space<vmem>>, %arg3: memref<64x512xf32, #tpu.memory_space<vmem>>, %arg4: memref<64x512xf32, #tpu.memory_space<vmem>>) attributes {dimension_semantics = [#tpu.dimension_semantics<parallel>, #tpu.dimension_semantics<parallel>], iteration_bounds = array<i64: 1, 1>, scalar_prefetch = 0 : i64, scratch_operands = 0 : i64, tpu.core_type = #tpu.core_type<tc>, window_params = [{transform_indices = @transform_0, window_bounds = array<i64: 64, 1>}, {transform_indices = @transform_1, window_bounds = array<i64: 64, 512>}, {transform_indices = @transform_2, window_bounds = array<i64: 64, 512>}]} {
    %c0 = arith.constant 0 : index
    %c0_0 = arith.constant 0 : index
    %0 = vector.load %arg3[%c0, %c0_0] : memref<64x512xf32, #tpu.memory_space<vmem>>, vector<64x512xf32>
    %c0_1 = arith.constant 0 : index
    %c0_2 = arith.constant 0 : index
    %1 = vector.load %arg2[%c0_1, %c0_2] : memref<64x1xf32, #tpu.memory_space<vmem>>, vector<64x1xf32>
    %2 = vector.broadcast %1 : vector<64x1xf32> to vector<64x512xf32>
    %3 = arith.addf %0, %2 : vector<64x512xf32>
    %c0_3 = arith.constant 0 : index
    %c0_4 = arith.constant 0 : index
    %4 = vector.load %arg4[%c0_3, %c0_4] : memref<64x512xf32, #tpu.memory_space<vmem>>, vector<64x512xf32>
    tpu.vector_store %arg4[%c0_3, %c0_4], %3 {strides = array<i32>} : memref<64x512xf32, #tpu.memory_space<vmem>>, vector<64x512xf32>,
    return
  }
  func.func @transform_0(%arg0: i32, %arg1: i32) -> (i32, i32) {
    %c0_i32 = arith.constant 0 : i32
    %c0_i32_0 = arith.constant 0 : i32
    return %arg0, %c0_i32 : i32, i32
  }
  func.func @transform_1(%arg0: i32, %arg1: i32) -> (i32, i32) {
    %c0_i32 = arith.constant 0 : i32
    return %arg0, %arg1 : i32, i32
  }
  func.func @transform_2(%arg0: i32, %arg1: i32) -> (i32, i32) {
    %c0_i32 = arith.constant 0 : i32
    return %arg0, %arg1 : i32, i32
  }
}

</mosaic_0001>

<bundles_post_ra>
// kernel: tpu_custom_call.1
= control target key start
LH: loop header
LB: loop body
LE: loop exit
PB: predicated region body
PF: predicated region fallthrough
CT: control target
= control target key end

     0   :  { %7 = vsyncpa [#allocation3], 0  ;;  %s294_s0 = inlined_call_operand.vmem [shape: f32[64,1], index: 0, kind: input, shape index: {}]   ;;  %s295_s1 = inlined_call_operand.hbm [shape: f32[64,512], index: 1, kind: input, shape index: {}]   ;;  %s296_s2 = inlined_call_operand.hbm [shape: f32[64,512], index: 2, kind: output, shape index: {}]  }
   0x1   :  { %8 = vsyncpa [#allocation4], 0  ;;  %s238_s9 = smov [#allocation2]  }
   0x2   :  { %s16_s10 = sshll.u32 %s238_s9, 4  ;;  %s17_s10 = int_to_ptr.vmem [resolvable:$true] %s16_s10 }
   0x3   :  { %s202_s11 = scalar_lea.vmem %s17_s10, 4096  ;;  %p207_p1 = scmp.lt.s32.totalorder %s17_s10, %s17_s10 }
   0x4   :  { %p203_p0 = scmp.ne.s32.totalorder %s17_s10, %s202_s11  ;;  %p208_p2 = scmp.lt.s32.totalorder %s202_s11, %s202_s11 }
   0x6   :  { %p209_p3 = por %p208_p2, %p207_p1 }
   0x8   :  { %p210_p4 = pnand %p209_p3, %p203_p0 }
   0xa   :  { %213 = shalt.err (!%p210_p4)
}
   0xb   :  { %s239_s12 = smov 512   ;;  %s240_s13 = smov 32  }
   0xc   :  { %22 = dma.hbm_to_vmem [thread:$0]  %s295_s1, 4096, %s17_s10, [#allocation3], %s239_s12, %s239_s12, %s240_s13  }
   0xd   :  { %234 = dma.done.wait [#allocation3], 4096  }
   0xe   :  { %235 = vsyncadd [#allocation3], 4294963200  ;;  %v241_v0 = vmov 0   ;;  %v60_v1 = vld [vmem:[%s294_s0 + $0x10] sm:$0xff]  ;;  %v58_v2 = vld [vmem:[%s294_s0] sm:$0xff] }
   0xf   :  { %193 = vset.pattern.permute.xlu1 %v241_v0  ;;  %192 = vset.pattern.permute.xlu0 %v241_v0  ;;  %v61_v3 = vld [vmem:[%s294_s0 + $0x18] sm:$0xff]  ;;  %v59_v4 = vld [vmem:[%s294_s0 + $0x8] sm:$0xff]  ;;  %v62_v6 = vld [vmem:[%s294_s0 + $0x20] sm:$0xff] }
  0x10   :  { %78 = vperm.xlu1 %193, %v60_v1   ;;  %68 = vperm.xlu0 %192, %v58_v2   ;;  %v63_v5 = vld [vmem:[%s294_s0 + $0x28] sm:$0xff]  ;;  %v65_v7 = vld [vmem:[%s294_s0 + $0x38] sm:$0xff]  ;;  %v64_v8 = vld [vmem:[%s294_s0 + $0x30] sm:$0xff]  ;;  %s242_s0 = smov [#allocation5]  }
  0x11   :  { %v34_v9 = vld [vmem:[#allocation2 + $0x40] sm:$0xff]  ;;  %v35_v10 = vld [vmem:[#allocation2 + $0x48] sm:$0xff]  ;;  %v36_v11 = vld [vmem:[#allocation2 + $0x50] sm:$0xff]  ;;  %s175_s3 = sshll.u32 %s242_s0, 4  ;;  %s176_s3 = int_to_ptr.vmem [resolvable:$true] %s175_s3 }
  0x12   :  { %v37_v12 = vld [vmem:[#allocation2 + $0x58] sm:$0xff]  ;;  %v26_v13 = vld [vmem:[#allocation2] sm:$0xff]  ;;  %v27_v14 = vld [vmem:[#allocation2 + $0x8] sm:$0xff]  ;;  %s214_s4 = scalar_lea.vmem %s176_s3, 4096  ;;  %p219_p6 = scmp.lt.s32.totalorder %s176_s3, %s176_s3 }
  0x13   :  { %v28_v15 = vld [vmem:[#allocation2 + $0x10] sm:$0xff]  ;;  %v29_v16 = vld [vmem:[#allocation2 + $0x18] sm:$0xff]  ;;  %v38_v23 = vld [vmem:[#allocation2 + $0x60] sm:$0xff]  ;;  %p215_p5 = scmp.ne.s32.totalorder %s176_s3, %s214_s4  ;;  %p220_p7 = scmp.lt.s32.totalorder %s214_s4, %s214_s4 }
  0x14   :  { %83 = vperm.xlu1 %193, %v61_v3   ;;  %73 = vperm.xlu0 %192, %v59_v4   ;;  %v39_v24 = vld [vmem:[#allocation2 + $0x68] sm:$0xff]  ;;  %v40_v29 = vld [vmem:[#allocation2 + $0x70] sm:$0xff]  ;;  %v41_v30 = vld [vmem:[#allocation2 + $0x78] sm:$0xff] }
  0x15   :  { %v30_v31 = vld [vmem:[#allocation2 + $0x20] sm:$0xff]  ;;  %v31_v32 = vld [vmem:[#allocation2 + $0x28] sm:$0xff]  ;;  %v32_v33 = vld [vmem:[#allocation2 + $0x30] sm:$0xff]  ;;  %p221_p8 = por %p220_p7, %p219_p6 }
  0x16   :  { %v33_v34 = vld [vmem:[#allocation2 + $0x38] sm:$0xff]  ;;  %v46_v41 = vld [vmem:[#allocation2 + $0xa0] sm:$0xff]  ;;  %v47_v42 = vld [vmem:[#allocation2 + $0xa8] sm:$0xff] }
  0x17   :  { %v48_v47 = vld [vmem:[#allocation2 + $0xb0] sm:$0xff]  ;;  %v49_v48 = vld [vmem:[#allocation2 + $0xb8] sm:$0xff]  ;;  %v42_v49 = vld [vmem:[#allocation2 + $0x80] sm:$0xff]  ;;  %p222_p9 = pnand %p221_p8, %p215_p5 }
  0x18   :  { %93 = vperm.xlu1 %193, %v63_v5   ;;  %88 = vperm.xlu0 %192, %v62_v6   ;;  %v43_v50 = vld [vmem:[#allocation2 + $0x88] sm:$0xff]  ;;  %v44_v51 = vld [vmem:[#allocation2 + $0x90] sm:$0xff]  ;;  %v45_v52 = vld [vmem:[#allocation2 + $0x98] sm:$0xff] }
  0x19   :  { %v54_v59 = vld [vmem:[#allocation2 + $0xe0] sm:$0xff]  ;;  %v55_v60 = vld [vmem:[#allocation2 + $0xe8] sm:$0xff]  ;;  %v56_v1 = vld [vmem:[#allocation2 + $0xf0] sm:$0xff] }
  0x1a   :  { %v57_v2 = vld [vmem:[#allocation2 + $0xf8] sm:$0xff]  ;;  %v50_v3 = vld [vmem:[#allocation2 + $0xc0] sm:$0xff]  ;;  %v51_v4 = vld [vmem:[#allocation2 + $0xc8] sm:$0xff] }
  0x1b   :  { %v52_v5 = vld [vmem:[#allocation2 + $0xd0] sm:$0xff]  ;;  %v53_v6 = vld [vmem:[#allocation2 + $0xd8] sm:$0xff] }
  0x1c   :  { %103 = vperm.xlu1 %193, %v65_v7   ;;  %98 = vperm.xlu0 %192, %v64_v8  }
  0x8b   :  { %v79_v17 = vpop.permute.xlu1 %78  ;;  %v69_v18 = vpop.permute.xlu0 %68 }
  0x8c   :  { %v114_v19 = vadd.f32 %v79_v17, %v34_v9  ;;  %v115_v20 = vadd.f32 %v79_v17, %v35_v10  ;;  %v116_v21 = vadd.f32 %v79_v17, %v36_v11  ;;  %v117_v22 = vadd.f32 %v79_v17, %v37_v12 }
  0x8d   :  { %v106_v25 = vadd.f32 %v69_v18, %v26_v13  ;;  %v107_v26 = vadd.f32 %v69_v18, %v27_v14  ;;  %v108_v27 = vadd.f32 %v69_v18, %v28_v15  ;;  %v109_v28 = vadd.f32 %v69_v18, %v29_v16 }
  0x8e   :  { %146 = vst [vmem:[#allocation5 + $0x40] sm:$0xff] %v114_v19  ;;  %147 = vst [vmem:[#allocation5 + $0x48] sm:$0xff] %v115_v20 }
  0x8f   :  { %148 = vst [vmem:[#allocation5 + $0x50] sm:$0xff] %v116_v21  ;;  %149 = vst [vmem:[#allocation5 + $0x58] sm:$0xff] %v117_v22  ;;  %v84_v35 = vpop.permute.xlu1 %83  ;;  %v74_v36 = vpop.permute.xlu0 %73 }
  0x90   :  { %138 = vst [vmem:[#allocation5] sm:$0xff] %v106_v25  ;;  %139 = vst [vmem:[#allocation5 + $0x8] sm:$0xff] %v107_v26  ;;  %v118_v37 = vadd.f32 %v84_v35, %v38_v23  ;;  %v119_v38 = vadd.f32 %v84_v35, %v39_v24  ;;  %v120_v39 = vadd.f32 %v84_v35, %v40_v29 }
  0x91   :  { %140 = vst [vmem:[#allocation5 + $0x10] sm:$0xff] %v108_v27  ;;  %141 = vst [vmem:[#allocation5 + $0x18] sm:$0xff] %v109_v28  ;;  %v121_v40 = vadd.f32 %v84_v35, %v41_v30  ;;  %v110_v43 = vadd.f32 %v74_v36, %v30_v31  ;;  %v111_v44 = vadd.f32 %v74_v36, %v31_v32 }
  0x92   :  { %v112_v45 = vadd.f32 %v74_v36, %v32_v33  ;;  %v113_v46 = vadd.f32 %v74_v36, %v33_v34  ;;  %150 = vst [vmem:[#allocation5 + $0x60] sm:$0xff] %v118_v37  ;;  %151 = vst [vmem:[#allocation5 + $0x68] sm:$0xff] %v119_v38 }
  0x93   :  { %152 = vst [vmem:[#allocation5 + $0x70] sm:$0xff] %v120_v39  ;;  %153 = vst [vmem:[#allocation5 + $0x78] sm:$0xff] %v121_v40  ;;  %v94_v53 = vpop.permute.xlu1 %93  ;;  %v89_v54 = vpop.permute.xlu0 %88 }
  0x94   :  { %142 = vst [vmem:[#allocation5 + $0x20] sm:$0xff] %v110_v43  ;;  %143 = vst [vmem:[#allocation5 + $0x28] sm:$0xff] %v111_v44  ;;  %v126_v55 = vadd.f32 %v94_v53, %v46_v41  ;;  %v127_v56 = vadd.f32 %v94_v53, %v47_v42  ;;  %v128_v57 = vadd.f32 %v94_v53, %v48_v47 }
  0x95   :  { %144 = vst [vmem:[#allocation5 + $0x30] sm:$0xff] %v112_v45  ;;  %145 = vst [vmem:[#allocation5 + $0x38] sm:$0xff] %v113_v46  ;;  %v129_v58 = vadd.f32 %v94_v53, %v49_v48  ;;  %v122_v61 = vadd.f32 %v89_v54, %v42_v49  ;;  %v123_v62 = vadd.f32 %v89_v54, %v43_v50 }
  0x96   :  { %v124_v63 = vadd.f32 %v89_v54, %v44_v51  ;;  %v125_v0 = vadd.f32 %v89_v54, %v45_v52  ;;  %158 = vst [vmem:[#allocation5 + $0xa0] sm:$0xff] %v126_v55  ;;  %159 = vst [vmem:[#allocation5 + $0xa8] sm:$0xff] %v127_v56 }
  0x97   :  { %160 = vst [vmem:[#allocation5 + $0xb0] sm:$0xff] %v128_v57  ;;  %161 = vst [vmem:[#allocation5 + $0xb8] sm:$0xff] %v129_v58  ;;  %v104_v7 = vpop.permute.xlu1 %103  ;;  %v99_v8 = vpop.permute.xlu0 %98 }
  0x98   :  { %154 = vst [vmem:[#allocation5 + $0x80] sm:$0xff] %v122_v61  ;;  %155 = vst [vmem:[#allocation5 + $0x88] sm:$0xff] %v123_v62  ;;  %v134_v9 = vadd.f32 %v104_v7, %v54_v59  ;;  %v135_v10 = vadd.f32 %v104_v7, %v55_v60  ;;  %v136_v11 = vadd.f32 %v104_v7, %v56_v1 }
  0x99   :  { %156 = vst [vmem:[#allocation5 + $0x90] sm:$0xff] %v124_v63  ;;  %157 = vst [vmem:[#allocation5 + $0x98] sm:$0xff] %v125_v0  ;;  %v137_v12 = vadd.f32 %v104_v7, %v57_v2  ;;  %v130_v13 = vadd.f32 %v99_v8, %v50_v3  ;;  %v131_v14 = vadd.f32 %v99_v8, %v51_v4 }
  0x9a   :  { %v132_v15 = vadd.f32 %v99_v8, %v52_v5  ;;  %v133_v16 = vadd.f32 %v99_v8, %v53_v6  ;;  %166 = vst [vmem:[#allocation5 + $0xe0] sm:$0xff] %v134_v9  ;;  %167 = vst [vmem:[#allocation5 + $0xe8] sm:$0xff] %v135_v10 }
  0x9b   :  { %168 = vst [vmem:[#allocation5 + $0xf0] sm:$0xff] %v136_v11  ;;  %169 = vst [vmem:[#allocation5 + $0xf8] sm:$0xff] %v137_v12 }
  0x9c   :  { %162 = vst [vmem:[#allocation5 + $0xc0] sm:$0xff] %v130_v13  ;;  %163 = vst [vmem:[#allocation5 + $0xc8] sm:$0xff] %v131_v14 }
  0x9d   :  { %164 = vst [vmem:[#allocation5 + $0xd0] sm:$0xff] %v132_v15  ;;  %165 = vst [vmem:[#allocation5 + $0xd8] sm:$0xff] %v133_v16 }
  0x9e   :  { %225 = shalt.err (!%p222_p9)
}
  0x9f   :  { %181 = dma.vmem_to_hbm [thread:$0]  %s176_s3, 4096, %s296_s2, [#allocation4], %s239_s12, %s239_s12, %s240_s13  }
  0xa0   :  { %236 = dma.done.wait [#allocation4], 4096  }
  0xa1   :  { %237 = vsyncadd [#allocation4], 4294963200 }
  0xa2   :  { %185 = vsyncpa [#allocation3], 1 }
  0xa3   :  { %186 = vsyncpa [#allocation4], 1 }

</bundles_post_ra>
